<compile_context>
chip_gen: v7x
topology: tpu7x:2x2x1
jax: 0.10.0
libtpu: 0.0.40
codegen_flags: <defaults>
</compile_context>

<pallas_src>
import functools

import jax
import jax.numpy as jnp
from jax.experimental import pallas as pl
from jax.experimental.pallas import tpu as pltpu

_MIB = 1024 * 1024


def _round_up(x, m):
    return (x + m - 1) // m * m


def _is_v7x():
    try:
        kind = jax.devices()[0].device_kind.lower()
        return "v7" in kind
    except Exception:
        return False


def _vmem_budget_bytes():
    """Scoped-VMEM budget per generation (leave headroom below physical)."""
    cap = None
    try:
        cap = int(pltpu.get_tpu_info().vmem_capacity_bytes)
    except Exception:
        cap = None
    if cap is None or cap <= 0:
        cap = 64 * _MIB if _is_v7x() else 128 * _MIB
    # 128 MiB (v5e/v6e) -> 96 MiB; 64 MiB per TC (v7x) -> 48 MiB.
    return min(96 * _MIB, int(0.75 * cap))


def _choose_tile(dim, align, target, max_tile):
    """Tile size for `dim`: multiple of `align`; one block if that fits under
    `max_tile`, else the candidate near `target` minimizing padding (ties ->
    larger tile for more HBM reuse)."""
    dim_al = _round_up(dim, align)
    if dim_al <= max_tile:
        return dim_al
    lo = _round_up(max(align, target // 2), align)
    best_t, best_key = None, None
    for cand in range(lo, max_tile + 1, align):
        pad = _round_up(dim, cand) - dim
        key = (pad, -cand)
        if best_key is None or key < best_key:
            best_key, best_t = key, cand
    return best_t


# ----------------------------- kernels ------------------------------------ #

def _fc_kernel_single_k(x_ref, w_ref, b_ref, o_ref, *, relu):
    """K fits in one block: dot + bias (+ReLU) written straight to o_ref."""
    out = jnp.dot(x_ref[...], w_ref[...], preferred_element_type=jnp.float32)
    out = out + b_ref[...].astype(jnp.float32)
    if relu:
        out = jnp.maximum(out, 0.0)
    o_ref[...] = out.astype(o_ref.dtype)


def _fc_kernel_multi_k_accout(x_ref, w_ref, b_ref, o_ref, *, relu):
    """K-reduction; accumulate directly into the resident f32 output block."""
    k = pl.program_id(2)

    @pl.when(k == 0)
    def _():
        o_ref[...] = jnp.zeros_like(o_ref)

    o_ref[...] += jnp.dot(x_ref[...], w_ref[...],
                          preferred_element_type=jnp.float32)

    @pl.when(k == pl.num_programs(2) - 1)
    def _():
        out = o_ref[...] + b_ref[...].astype(jnp.float32)
        if relu:
            out = jnp.maximum(out, 0.0)
        o_ref[...] = out


def _fc_kernel_multi_k_scratch(x_ref, w_ref, b_ref, o_ref, acc_ref, *, relu):
    """K-reduction with an f32 scratch accumulator (non-f32 output dtype)."""
    k = pl.program_id(2)

    @pl.when(k == 0)
    def _():
        acc_ref[...] = jnp.zeros_like(acc_ref)

    acc_ref[...] += jnp.dot(x_ref[...], w_ref[...],
                            preferred_element_type=jnp.float32)

    @pl.when(k == pl.num_programs(2) - 1)
    def _():
        out = acc_ref[...] + b_ref[...].astype(jnp.float32)
        if relu:
            out = jnp.maximum(out, 0.0)
        o_ref[...] = out.astype(o_ref.dtype)


# ----------------------------- wrapper ------------------------------------ #

def prepare_fc_weight(weight):
    """One-time (hoistable) conversion of a PyTorch (N, K) weight to the
    (K, N) layout the kernel consumes. Do this at parameter-init time and
    pass weight_layout=\"KN\" to fc_forward."""
    return jnp.asarray(weight).T


def fc_forward(x, weight, bias, *, relu=True, weight_layout="NK",
               tm=None, tn=None, tk=None, mxu_dtype=None):
    """y = x @ W^T + b, optional ReLU (torch.nn.Linear semantics).

    weight_layout: "NK" (PyTorch layout, transposed once here) or "KN"
                   (already (K, N), e.g. from prepare_fc_weight).
    mxu_dtype:     optional operand cast (e.g. jnp.bfloat16) -- halves HBM
                   traffic and uses the native bf16 MXU; accumulation and the
                   bias/ReLU epilogue stay f32. Results then differ from the
                   f32 reference beyond 1e-5.
    """
    M, K = x.shape
    if weight_layout == "NK":
        N, K2 = weight.shape
        weight = weight.T          # one-time layout fix; hoist via prepare_fc_weight
    else:
        K2, N = weight.shape
    assert K2 == K and bias.shape == (N,)
    out_dtype = x.dtype
    out_elt = jnp.dtype(out_dtype).itemsize

    if mxu_dtype is not None:
        x = x.astype(mxu_dtype)
        weight = weight.astype(mxu_dtype)
    in_elt = jnp.dtype(x.dtype).itemsize

    # Sublane packing of the MXU operand dtype (f32:8, bf16:16, int8/fp8:32).
    sub = {4: 8, 2: 16, 1: 32}.get(in_elt, 8)

    budget = _vmem_budget_bytes()
    fit_budget = int(0.8 * budget)
    acc_in_out = (out_dtype == jnp.float32)  # accumulate straight into o_ref

    def vmem_est(tm_, tn_, tk_, multi_k):
        b = 2 * (tm_ * tk_ + tn_ * tk_) * in_elt   # x / W tiles, double-buffered
        b += 2 * tn_ * 4                           # bias tile
        b += 2 * tm_ * tn_ * out_elt               # output tile
        if multi_k and not acc_in_out:
            b += tm_ * tn_ * 4                     # accumulator scratch
        return b

    # ---- Tile selection: large, aligned, minimal padding, VMEM-budgeted. ----
    tm = _round_up(tm, sub) if tm else _choose_tile(M, sub, 512, 1024)
    tn = _round_up(tn, 128) if tn else _choose_tile(N, 128, 512, 1024)

    K_al = _round_up(K, 128)
    if tk:
        tk = _round_up(tk, 128)
    elif vmem_est(tm, tn, K_al, False) <= fit_budget:
        tk = K_al                                   # single-K fast path
    else:
        tk = _choose_tile(K, 128, 1024, 2048)

    def n_kblocks(tk_):
        return _round_up(K, tk_) // tk_

    # Shrink until the double-buffered working set fits the budget
    # (tk first: tm/tn drive HBM reuse and are more valuable).
    while vmem_est(tm, tn, tk, n_kblocks(tk) > 1) > fit_budget:
        if tk > 512:
            tk = _round_up(tk // 2, 128)
        elif tn > 256:
            tn = _round_up(tn // 2, 128)
        elif tm > max(sub, 128):
            tm = _round_up(tm // 2, sub)
        elif tk > 128:
            tk = _round_up(tk // 2, 128)
        else:
            break

    Mp, Np, Kp = _round_up(M, tm), _round_up(N, tn), _round_up(K, tk)

    # Give the second TensorCore work on v7x only; on single-TC v5e/v6e the
    # split just narrows the lane-dense store and adds a grid step.
    if (_is_v7x() and Mp // tm == 1 and Np // tn == 1
            and Np >= 256 and Np % 256 == 0):
        tn = Np // 2

    nm, nn, nk = Mp // tm, Np // tn, Kp // tk

    # ---- Zero-pad only when needed (K padding is matmul-neutral; padded N
    # columns are sliced off at the end). ----
    if (Mp, Kp) != (M, K):
        x = jnp.pad(x, ((0, Mp - M), (0, Kp - K)))
    if (Kp, Np) != (K, N):
        weight = jnp.pad(weight, ((0, Kp - K), (0, Np - N)))
    b2 = bias if Np == N else jnp.pad(bias, (0, Np - N))
    b2 = b2.reshape(1, Np)  # (1, Np) for lane-dense broadcast over rows

    # Realistic tiled HBM traffic: x re-read per N-block, W re-read per M-block.
    cost = pl.CostEstimate(
        flops=2 * M * N * K,
        transcendentals=0,
        bytes_accessed=(nn * Mp * Kp + nm * Np * Kp) * in_elt
        + Mp * Np * out_elt + nm * Np * 4,
    )

    vmem_limit = int(min(budget,
                         max(2 * vmem_est(tm, tn, tk, nk > 1), 16 * _MIB)))

    if nk == 1:
        kernel = functools.partial(_fc_kernel_single_k, relu=relu)
        grid_spec = pltpu.PrefetchScalarGridSpec(
            num_scalar_prefetch=0,
            grid=(nm, nn),
            in_specs=[
                pl.BlockSpec((tm, tk), lambda i, j: (i, 0)),   # x tile
                pl.BlockSpec((tk, tn), lambda i, j: (0, j)),   # W tile (K,N)
                pl.BlockSpec((1, tn), lambda i, j: (0, j)),    # bias tile
            ],
            out_specs=pl.BlockSpec((tm, tn), lambda i, j: (i, j)),
        )
        dim_sem = ("parallel", "parallel")
    elif acc_in_out:
        kernel = functools.partial(_fc_kernel_multi_k_accout, relu=relu)
        grid_spec = pltpu.PrefetchScalarGridSpec(
            num_scalar_prefetch=0,
            grid=(nm, nn, nk),
            in_specs=[
                pl.BlockSpec((tm, tk), lambda i, j, k: (i, k)),  # x tile
                pl.BlockSpec((tk, tn), lambda i, j, k: (k, j)),  # W tile (K,N)
                pl.BlockSpec((1, tn), lambda i, j, k: (0, j)),   # bias tile
            ],
            out_specs=pl.BlockSpec((tm, tn), lambda i, j, k: (i, j)),
        )
        dim_sem = ("parallel", "parallel", "arbitrary")
    else:
        kernel = functools.partial(_fc_kernel_multi_k_scratch, relu=relu)
        grid_spec = pltpu.PrefetchScalarGridSpec(
            num_scalar_prefetch=0,
            grid=(nm, nn, nk),
            in_specs=[
                pl.BlockSpec((tm, tk), lambda i, j, k: (i, k)),
                pl.BlockSpec((tk, tn), lambda i, j, k: (k, j)),
                pl.BlockSpec((1, tn), lambda i, j, k: (0, j)),
            ],
            out_specs=pl.BlockSpec((tm, tn), lambda i, j, k: (i, j)),
            scratch_shapes=[pltpu.VMEM((tm, tn), jnp.float32)],
        )
        dim_sem = ("parallel", "parallel", "arbitrary")

    y = pl.pallas_call(
        kernel,
        out_shape=jax.ShapeDtypeStruct((Mp, Np), out_dtype),
        grid_spec=grid_spec,
        compiler_params=pltpu.CompilerParams(
            dimension_semantics=dim_sem,
            vmem_limit_bytes=vmem_limit,
        ),
        cost_estimate=cost,
    )(x, weight, b2)

    if (Mp, Np) != (M, N):
        y = y[:M, :N]
    return y


def init_fc_params(key, in_features, out_features):
    """Deterministic init matching the module: xavier_normal weight,
    default nn.Linear uniform(-1/sqrt(in), 1/sqrt(in)) bias."""
    kw, kb = jax.random.split(key)
    std = (2.0 / (in_features + out_features)) ** 0.5
    weight = std * jax.random.normal(kw, (out_features, in_features), jnp.float32)
    bound = 1.0 / (in_features ** 0.5)
    bias = jax.random.uniform(
        kb, (out_features,), jnp.float32, minval=-bound, maxval=bound
    )
    return weight, bias


if __name__ == "__main__":
    key = jax.random.PRNGKey(0)
    k_x, k_p, k_x2, k_p2 = jax.random.split(key, 4)

    # 1) Small FC, PyTorch (N, K) weight layout, single-K fast path, ReLU on.
    M, K, N = 8, 32, 128
    x = jax.random.normal(k_x, (M, K), jnp.float32)
    weight, bias = init_fc_params(k_p, K, N)
    y = jax.block_until_ready(fc_forward(x, weight, bias, relu=True))
    y_ref = jnp.maximum(x @ weight.T + bias, 0.0)
    assert y.shape == (M, N)
    assert jnp.allclose(y, y_ref, atol=1e-5, rtol=1e-5)

    # 2) Pre-transposed (K, N) weight (hoisted layout fix) + forced small tk
    #    to exercise the multi-K accumulate-into-output path, ReLU off.
    M2, K2, N2 = 16, 256, 256
    x2 = jax.random.normal(k_x2, (M2, K2), jnp.float32)
    w2, b2 = init_fc_params(k_p2, K2, N2)
    w2_kn = prepare_fc_weight(w2)
    y2 = jax.block_until_ready(
        fc_forward(x2, w2_kn, b2, relu=False, weight_layout="KN", tk=128))
    y2_ref = x2 @ w2.T + b2
    assert y2.shape == (M2, N2)
    assert jnp.allclose(y2, y2_ref, atol=1e-4, rtol=1e-4)

    print("KERNEL_OK")
</pallas_src>

<mosaic_0001>
module attributes {stable_mosaic.version = 11 : i64} {
  func.func @_fc_kernel_single_k(%arg0: i32, %arg1: i32, %arg2: memref<8x128xf32, #tpu.memory_space<vmem>>, %arg3: memref<128x128xf32, #tpu.memory_space<vmem>>, %arg4: memref<1x128xf32, #tpu.memory_space<vmem>>, %arg5: memref<8x128xf32, #tpu.memory_space<vmem>>) attributes {dimension_semantics = [#tpu.dimension_semantics<parallel>, #tpu.dimension_semantics<parallel>], iteration_bounds = array<i64: 1, 1>, scalar_prefetch = 0 : i64, scratch_operands = 0 : i64, tpu.core_type = #tpu.core_type<tc>, window_params = [{transform_indices = @transform_0, window_bounds = array<i64: 8, 128>}, {transform_indices = @transform_1, window_bounds = array<i64: 128, 128>}, {transform_indices = @transform_2, window_bounds = array<i64: 1, 128>}, {transform_indices = @transform_3, window_bounds = array<i64: 8, 128>}]} {
    %c0 = arith.constant 0 : index
    %c0_0 = arith.constant 0 : index
    %0 = vector.load %arg2[%c0, %c0_0] : memref<8x128xf32, #tpu.memory_space<vmem>>, vector<8x128xf32>
    %c0_1 = arith.constant 0 : index
    %c0_2 = arith.constant 0 : index
    %1 = vector.load %arg3[%c0_1, %c0_2] : memref<128x128xf32, #tpu.memory_space<vmem>>, vector<128x128xf32>
    %cst = arith.constant dense<0.000000e+00> : vector<8x128xf32>
    %2 = tpu.matmul %0, %1, %cst {dimension_numbers = #tpu.dot_dimension_numbers<[1], [0], [0], [1], [0, 0, 1, 1], [], []>} : vector<8x128xf32>, vector<128x128xf32>, vector<8x128xf32> -> vector<8x128xf32>
    %c0_3 = arith.constant 0 : index
    %c0_4 = arith.constant 0 : index
    %3 = vector.load %arg4[%c0_3, %c0_4] : memref<1x128xf32, #tpu.memory_space<vmem>>, vector<1x128xf32>
    %4 = vector.broadcast %3 : vector<1x128xf32> to vector<8x128xf32>
    %5 = arith.addf %2, %4 : vector<8x128xf32>
    %cst_5 = arith.constant 0.000000e+00 : f32
    %6 = vector.broadcast %cst_5 : f32 to vector<8x128xf32>
    %7 = arith.maximumf %5, %6 : vector<8x128xf32>
    %c0_6 = arith.constant 0 : index
    %c0_7 = arith.constant 0 : index
    %8 = vector.load %arg5[%c0_6, %c0_7] : memref<8x128xf32, #tpu.memory_space<vmem>>, vector<8x128xf32>
    tpu.vector_store %arg5[%c0_6, %c0_7], %7 {strides = array<i32>} : memref<8x128xf32, #tpu.memory_space<vmem>>, vector<8x128xf32>,
    return
  }
  func.func @transform_0(%arg0: i32, %arg1: i32) -> (i32, i32) {
    %c0_i32 = arith.constant 0 : i32
    %c0_i32_0 = arith.constant 0 : i32
    return %arg0, %c0_i32 : i32, i32
  }
  func.func @transform_1(%arg0: i32, %arg1: i32) -> (i32, i32) {
    %c0_i32 = arith.constant 0 : i32
    %c0_i32_0 = arith.constant 0 : i32
    return %c0_i32, %arg1 : i32, i32
  }
  func.func @transform_2(%arg0: i32, %arg1: i32) -> (i32, i32) {
    %c0_i32 = arith.constant 0 : i32
    %c0_i32_0 = arith.constant 0 : i32
    return %c0_i32, %arg1 : i32, i32
  }
  func.func @transform_3(%arg0: i32, %arg1: i32) -> (i32, i32) {
    %c0_i32 = arith.constant 0 : i32
    return %arg0, %arg1 : i32, i32
  }
}

</mosaic_0001>

<bundles_post_ra>
// kernel: tpu_custom_call.1
= control target key start
LH: loop header
LB: loop body
LE: loop exit
PB: predicated region body
PF: predicated region fallthrough
CT: control target
= control target key end

     0   :  { %8 = vsyncpa [#allocation3], 0  ;;  %s384_s0 = inlined_call_operand.hbm [shape: f32[8,128], index: 0, kind: input, shape index: {}]   ;;  %s385_s1 = inlined_call_operand.hbm [shape: f32[128,128], index: 1, kind: input, shape index: {}]   ;;  %s386_s2 = inlined_call_operand.vmem [shape: f32[1,128], index: 2, kind: input, shape index: {}]   ;;  %s387_s3 = inlined_call_operand.hbm [shape: f32[8,128], index: 3, kind: output, shape index: {}]  }
   0x1   :  { %9 = vsyncpa [#allocation6], 0 }
   0x2   :  { %10 = vsyncpa [#allocation4], 0  ;;  %s310_s12 = smov [#allocation2]   ;;  %s311_s14 = smov [#allocation5]  }
   0x3   :  { %s17_s13 = sshll.u32 %s310_s12, 4  ;;  %s26_s15 = sshll.u32 %s311_s14, 4  ;;  %s18_s13 = int_to_ptr.vmem [resolvable:$true] %s17_s13  ;;  %s338_s15 = int_to_ptr.vmem [resolvable:$true] %s26_s15 }
   0x4   :  { %s238_s18 = scalar_lea.hbm %s384_s0, 128 }
   0x5   :  { %p239_p0 = scmp.ne.s32.totalorder %s384_s0, %s238_s18  ;;  %p242_p1 = scmp.lt.u32.totalorder %s238_s18, %s384_s0 }
   0x7   :  { %p244_p2 = pnand %p242_p1, %p239_p0 }
   0x9   :  { %247 = shalt.err (!%p244_p2)
}
   0xa   :  { %s248_s23 = scalar_lea.vmem %s18_s13, 128  ;;  %p253_p4 = scmp.lt.s32.totalorder %s18_s13, %s18_s13 }
   0xb   :  { %p249_p3 = scmp.ne.s32.totalorder %s18_s13, %s248_s23  ;;  %p254_p5 = scmp.lt.s32.totalorder %s248_s23, %s248_s23 }
   0xd   :  { %p255_p6 = por %p254_p5, %p253_p4 }
   0xf   :  { %p256_p7 = pnand %p255_p6, %p249_p3 }
  0x11   :  { %259 = shalt.err (!%p256_p7)
}
  0x12   :  { %20 = dma.hbm_to_vmem [thread:$0]  %s384_s0, 128, %s18_s13, [#allocation3]  }
  0x13   :  { %s260_s28 = scalar_lea.hbm %s385_s1, 2048 }
  0x14   :  { %p261_p8 = scmp.ne.s32.totalorder %s385_s1, %s260_s28  ;;  %p264_p9 = scmp.lt.u32.totalorder %s260_s28, %s385_s1 }
  0x16   :  { %p266_p10 = pnand %p264_p9, %p261_p8 }
  0x18   :  { %269 = shalt.err (!%p266_p10)
}
  0x19   :  { %s270_s6 = scalar_lea.vmem %s338_s15, 2048  ;;  %p275_p12 = scmp.lt.s32.totalorder %s338_s15, %s338_s15 }
  0x1a   :  { %p271_p11 = scmp.ne.s32.totalorder %s338_s15, %s270_s6  ;;  %p276_p13 = scmp.lt.s32.totalorder %s270_s6, %s270_s6 }
  0x1c   :  { %p277_p0 = por %p276_p13, %p275_p12 }
  0x1e   :  { %p278_p1 = pnand %p277_p0, %p271_p11 }
  0x20   :  { %281 = shalt.err (!%p278_p1)
}
  0x21   :  { %s312_s0 = smov 128   ;;  %s313_s7 = smov 8  }
  0x22   :  { %32 = dma.hbm_to_vmem [thread:$0]  %s385_s1, 2048, %s338_s15, [#allocation6], %s312_s0, %s312_s0, %s313_s7  }
  0x23   :  { %304 = dma.done.wait [#allocation3], 128  }
  0x24   :  { %305 = vsyncadd [#allocation3], 4294967168 }
  0x25   :  { %306 = dma.done.wait [#allocation6], 2048  }
  0x26   :  { %307 = vsyncadd [#allocation6], 4294965248  ;;  %v314_v0 = vmov 0.0|0.0   ;;  %vm315_vm0 = vmmov 0   ;;  %v316_v1 = vmov 0.0   ;;  %v42_v2 = vld [vmem:[#allocation5] sm:$0xff] }
  0x27   :  { %206 = vmatprep.subr.bf16.mxu0 %v314_v0  ;;  %203 = vmatprep.mubr.msk.f32.mxu0 %vm315_vm0, %v316_v1  ;;  %v43_v3 = vld [vmem:[#allocation5 + $0x8] sm:$0xff]  ;;  %v44_v4 = vld [vmem:[#allocation5 + $0x10] sm:$0xff]  ;;  %v45_v6 = vld [vmem:[#allocation5 + $0x18] sm:$0xff]  ;;  %s317_s11 = smov [#allocation7]  }
  0x28   :  { %v207_v5 = vpack.c.bf16 %v43_v3, %v42_v2  ;;  %v210_v7 = vpack.c.bf16 %v45_v6, %v44_v4  ;;  %v46_v8 = vld [vmem:[#allocation5 + $0x20] sm:$0xff]  ;;  %v47_v9 = vld [vmem:[#allocation5 + $0x28] sm:$0xff]  ;;  %v48_v11 = vld [vmem:[#allocation5 + $0x30] sm:$0xff]  ;;  %s143_s12 = sshll.u32 %s317_s11, 4  ;;  %s144_s12 = int_to_ptr.vmem [resolvable:$true] %s143_s12 }
  0x29   :  { %v213_v10 = vpack.c.bf16 %v47_v9, %v46_v8  ;;  %v49_v12 = vld [vmem:[#allocation5 + $0x38] sm:$0xff]  ;;  %v50_v14 = vld [vmem:[#allocation5 + $0x40] sm:$0xff]  ;;  %v51_v15 = vld [vmem:[#allocation5 + $0x48] sm:$0xff]  ;;  %s282_s13 = scalar_lea.vmem %s144_s12, 128  ;;  %p287_p3 = scmp.lt.s32.totalorder %s144_s12, %s144_s12 }
  0x2a   :  { %208 = vmatpush3.bf16.msra.mxu0 %v207_v5  ;;  %v216_v13 = vpack.c.bf16 %v49_v12, %v48_v11  ;;  %v219_v16 = vpack.c.bf16 %v51_v15, %v50_v14  ;;  %v52_v17 = vld [vmem:[#allocation5 + $0x50] sm:$0xff]  ;;  %v53_v18 = vld [vmem:[#allocation5 + $0x58] sm:$0xff]  ;;  %v54_v20 = vld [vmem:[#allocation5 + $0x60] sm:$0xff]  ;;  %p283_p2 = scmp.ne.s32.totalorder %s144_s12, %s282_s13  ;;  %p288_p4 = scmp.lt.s32.totalorder %s282_s13, %s282_s13 }
  0x2b   :  { %209 = vmatprep.subr.bf16.mxu0 %v314_v0  ;;  %v222_v19 = vpack.c.bf16 %v53_v18, %v52_v17  ;;  %v55_v21 = vld [vmem:[#allocation5 + $0x68] sm:$0xff]  ;;  %v56_v23 = vld [vmem:[#allocation5 + $0x70] sm:$0xff]  ;;  %v57_v24 = vld [vmem:[#allocation5 + $0x78] sm:$0xff] }
  0x2c   :  { %v225_v22 = vpack.c.bf16 %v55_v21, %v54_v20  ;;  %v228_v25 = vpack.c.bf16 %v57_v24, %v56_v23  ;;  %v41_v26 = vld [vmem:[#allocation2] sm:$0xff]  ;;  %p289_p5 = por %p288_p4, %p287_p3 }
  0x2d   :  { %v153_v27 = vld [vmem:[%s386_s2] ss:$0 sm:$0xff] }
  0x2e   :  { %211 = vmatpush3.bf16.msra.mxu0 %v210_v7  ;;  %p290_p6 = pnand %p289_p5, %p283_p2 }
  0x2f   :  { %212 = vmatprep.subr.bf16.mxu0 %v314_v0 }
  0x32   :  { %214 = vmatpush3.bf16.msra.mxu0 %v213_v10 }
  0x33   :  { %215 = vmatprep.subr.bf16.mxu0 %v314_v0 }
  0x36   :  { %217 = vmatpush3.bf16.msra.mxu0 %v216_v13 }
  0x37   :  { %218 = vmatprep.subr.bf16.mxu0 %v314_v0 }
  0x3a   :  { %220 = vmatpush3.bf16.msra.mxu0 %v219_v16 }
  0x3b   :  { %221 = vmatprep.subr.bf16.mxu0 %v314_v0 }
  0x3e   :  { %223 = vmatpush3.bf16.msra.mxu0 %v222_v19 }
  0x3f   :  { %224 = vmatprep.subr.bf16.mxu0 %v314_v0 }
  0x42   :  { %226 = vmatpush3.bf16.msra.mxu0 %v225_v22 }
  0x43   :  { %227 = vmatprep.subr.bf16.mxu0 %v314_v0 }
  0x46   :  { %229 = vmatpush3.bf16.msra.mxu0 %v228_v25 }
  0x49   :  { %204 = vmatmul.mubr.f32.vlgmr.msra.gmra.mrb[0].mxu0 %v41_v26 }
 0x11c   :  { %v131_v28 = vpop.f32.mrb[0].mxu0 }
 0x11d   :  { %v132_v29 = vadd.f32 %v153_v27, %v131_v28  ;;  %v205_v30 = vpop.f32.mrb[1].mxu0 }
 0x11f   :  { %v135_v31 = vmax.f32 %v132_v29, 0.0 }
 0x121   :  { %136 = vst [vmem:[#allocation7] sm:$0xff] %v135_v31 }
 0x122   :  { %293 = shalt.err (!%p290_p6)
}
 0x123   :  { %s294_s16 = scalar_lea.hbm %s387_s3, 128 }
 0x124   :  { %p295_p7 = scmp.ne.s32.totalorder %s387_s3, %s294_s16  ;;  %p298_p8 = scmp.lt.u32.totalorder %s294_s16, %s387_s3 }
 0x126   :  { %p300_p9 = pnand %p298_p8, %p295_p7 }
 0x128   :  { %303 = shalt.err (!%p300_p9)
}
 0x129   :  { %146 = dma.vmem_to_hbm [thread:$0]  %s144_s12, 128, %s387_s3, [#allocation4]  }
 0x12a   :  { %308 = dma.done.wait [#allocation4], 128  }
 0x12b   :  { %309 = vsyncadd [#allocation4], 4294967168 }
 0x12c   :  { %150 = vsyncpa [#allocation3], 1 }
 0x12d   :  { %151 = vsyncpa [#allocation6], 1 }
 0x12e   :  { %152 = vsyncpa [#allocation4], 1 }

</bundles_post_ra>
